<compile_context>
chip_gen: v7x
topology: tpu7x:2x2x1
jax: 0.10.0
libtpu: 0.0.40
codegen_flags: <defaults>
</compile_context>

<pallas_src>
import math

import jax
import jax.numpy as jnp
from jax.experimental import pallas as pl
from jax.experimental.pallas import tpu as pltpu

_MIB = 1024 * 1024


def _make_kernel(feat_views: int):
    def fusion_kernel(w_ref, x_ref, b_ref, o_ref):
        # w_ref: SMEM (feat_views,) f32 scalar weights
        # x_ref: VMEM (feat_views, TR, L)
        # b_ref: VMEM (1, L) or (TR, L)
        # o_ref: VMEM (TR, L)
        # Scale each view once (scalar SMEM reads hoisted out of the chain),
        # then pairwise/tree-reduce so the VPU dependency chain is O(log V).
        terms = [x_ref[v].astype(jnp.float32) * w_ref[v] for v in range(feat_views)]
        while len(terms) > 1:
            nxt = [terms[i] + terms[i + 1] for i in range(0, len(terms) - 1, 2)]
            if len(terms) % 2:
                nxt.append(terms[-1])
            terms = nxt
        o_ref[...] = (terms[0] + b_ref[...].astype(jnp.float32)).astype(o_ref.dtype)

    return fusion_kernel


def _sublane_multiple(itemsize: int) -> int:
    # Packed-sublane granularity: f32 -> 8, bf16 -> 16, int8/fp8 -> 32.
    return {4: 8, 2: 16, 1: 32}.get(itemsize, 8)


def _round_up(x: int, m: int) -> int:
    return ((x + m - 1) // m) * m


def _vmem_capacity_bytes() -> int:
    try:
        return int(pltpu.get_tpu_info().vmem_capacity_bytes)
    except Exception:
        return 64 * _MIB  # conservative (v7x per-TC) fallback


def _default_budget(vmem_cap: int) -> int:
    # Double-buffered in-flight byte budget. v7x (64 MiB VMEM) -> ~24 MiB,
    # v5e/v6e (128 MiB) -> 32 MiB; keeps per-step pipeline overhead small.
    return min(32 * _MIB, max(8 * _MIB, vmem_cap // 2 - 8 * _MIB))


def _choose_tile_rows(n_rows, per_row_bytes, budget_bytes, quantum):
    tr = max(1, budget_bytes // per_row_bytes)
    if tr >= n_rows:
        return n_rows  # full block (equal to array dim -> always legal)
    tr = max(quantum, (tr // quantum) * quantum)
    return min(tr, n_rows)


def weight_fusion(x, weight, bias=None, *, vmem_budget_bytes=None):
    """x: (V, N, D); weight: (V,) or (1,1,V); bias: (D,) or None -> (N, D)."""
    V, N, D = x.shape
    out_dtype = x.dtype
    itemsize = jnp.dtype(x.dtype).itemsize

    weight = jnp.asarray(weight).reshape(-1).astype(jnp.float32)
    if bias is None:
        bias = jnp.zeros((D,), dtype=jnp.float32)
    bias = jnp.asarray(bias)
    b_itemsize = jnp.dtype(bias.dtype).itemsize

    vmem_cap = _vmem_capacity_bytes()
    if vmem_budget_bytes is None:
        vmem_budget_bytes = _default_budget(vmem_cap)
    # Keep caller-supplied budgets safely inside physical VMEM.
    vmem_budget_bytes = int(min(vmem_budget_bytes, max(_MIB, vmem_cap - 16 * _MIB)))

    # ---- lane-dense repack ------------------------------------------------
    # Whenever D is not a multiple of 128 but N*D is, reinterpret the
    # row-major (V, N, D) array as (V, N*D/128, 128) so every store is a
    # full-width 128-lane vst (no masked vst.msk). The bias pattern repeats
    # every lcm(D, 128) elements == `period` repacked rows.
    if (D % 128 != 0) and ((N * D) % 128 == 0):
        lanes = 128
        rows = (N * D) // 128
        period = (D * 128 // math.gcd(D, 128)) // 128  # lcm(D, 128) / 128
        x_k = x.reshape(V, rows, lanes)
        repacked = True
    else:
        lanes = D
        rows = N
        period = 1
        x_k = x
        repacked = False

    sub = _sublane_multiple(itemsize)
    quantum = sub * period // math.gcd(sub, period)  # lcm(sublane mult, bias period)
    bias_scales_with_tile = repacked and period > 1

    # Double-buffered in-flight bytes per tile-row (V inputs + 1 output [+ bias]).
    per_row = 2 * (V + 1) * lanes * itemsize
    if bias_scales_with_tile:
        per_row += 2 * lanes * b_itemsize
    tr = _choose_tile_rows(rows, per_row, vmem_budget_bytes, quantum)

    # v7x has two TensorCores: ensure >= 2 grid steps on the "parallel" row
    # axis whenever a single block would otherwise cover everything.
    if tr >= rows and rows >= 2 * quantum:
        tr = min(rows, _round_up(pl.cdiv(rows, 2), quantum))

    # ---- bias block ---------------------------------------------------------
    if not repacked:
        bias_k = bias.reshape(1, lanes)
    elif period == 1:
        bias_k = jnp.tile(bias, lanes // D).reshape(1, lanes)
    else:
        # tr is either a multiple of `period` or equal to `rows` (itself a
        # multiple of `period`), so tr*lanes is divisible by D and the same
        # bias tile is valid on every grid step.
        reps = (tr * lanes) // D
        bias_k = jnp.tile(bias, reps).reshape(tr, lanes)
    bias_rows = bias_k.shape[0]

    num_tiles = pl.cdiv(rows, tr)

    # Tie the scoped-VMEM limit to what this launch actually needs.
    in_flight = 2 * (V + 1) * tr * lanes * itemsize + 2 * bias_rows * lanes * b_itemsize
    vmem_limit = int(min(vmem_cap, max(16 * _MIB, in_flight + 4 * _MIB)))

    cost = pl.CostEstimate(
        flops=2 * V * N * D,
        transcendentals=0,
        bytes_accessed=(V + 1) * N * D * itemsize + int(bias.size) * b_itemsize,
    )

    out = pl.pallas_call(
        _make_kernel(V),
        out_shape=jax.ShapeDtypeStruct((rows, lanes), out_dtype),
        grid=(num_tiles,),
        in_specs=[
            # Scalar weights -> SMEM, whole (tiny) array, no tiling.
            pl.BlockSpec(memory_space=pltpu.MemorySpace.SMEM),
            # Per-view data: tile over the row axis, all V views per step.
            pl.BlockSpec((V, tr, lanes), lambda i: (0, i, 0)),
            # Bias: same block every step (DMA'd once, stays resident).
            pl.BlockSpec((bias_rows, lanes), lambda i: (0, 0)),
        ],
        out_specs=pl.BlockSpec((tr, lanes), lambda i: (i, 0)),
        compiler_params=pltpu.CompilerParams(
            dimension_semantics=("parallel",),  # rows are independent
            vmem_limit_bytes=vmem_limit,
        ),
        cost_estimate=cost,
    )(weight, x_k, bias_k)

    if repacked:
        out = out.reshape(N, D)
    return out


def init_params(key, feat_views, feat_dim, dtype=jnp.float32):
    # Mirrors nn.init.kaiming_uniform_(a=sqrt(5)) on a (1,1,V) tensor:
    # fan_in = V  ->  weight ~ U(-1/sqrt(V), 1/sqrt(V)), bias ~ U(-1/sqrt(V), 1/sqrt(V))
    kw, kb = jax.random.split(key)
    bound = 1.0 / math.sqrt(feat_views)
    weight = jax.random.uniform(kw, (feat_views,), dtype, -bound, bound)
    bias = jax.random.uniform(kb, (feat_dim,), dtype, -bound, bound)
    return weight, bias


def _reference(x, weight, bias):
    return jnp.sum(x * weight[:, None, None], axis=0) + bias[None, :]


if __name__ == "__main__":
    key = jax.random.PRNGKey(0)

    # Case 1: module-sized example, D < 128 -> lane-dense repacked path (period 1).
    V1, N1, D1 = 4, 8, 32
    k1, k2, key = jax.random.split(key, 3)
    x1 = jax.random.normal(k1, (V1, N1, D1), jnp.float32)
    w1, b1 = init_params(k2, V1, D1)
    o1 = jax.block_until_ready(weight_fusion(x1, w1, b1))
    assert o1.shape == (N1, D1)
    assert jnp.allclose(o1, _reference(x1, w1, b1), atol=1e-5, rtol=1e-5)

    # Case 2: lane-aligned D; tiny budget forces a multi-tile pipeline with a
    # partial last block.
    V2, N2, D2 = 4, 512, 256
    k3, k4, key = jax.random.split(key, 3)
    x2 = jax.random.normal(k3, (V2, N2, D2), jnp.float32)
    w2, b2 = init_params(k4, V2, D2)
    o2 = jax.block_until_ready(weight_fusion(x2, w2, b2, vmem_budget_bytes=1 * _MIB))
    assert o2.shape == (N2, D2)
    assert jnp.allclose(o2, _reference(x2, w2, b2), atol=1e-5, rtol=1e-5)

    # Case 3: D = 48 (neither divisor nor multiple of 128) -> widened
    # lane-dense repack with bias period > 1, multiple tiles.
    V3, N3, D3 = 3, 128, 48
    k5, k6 = jax.random.split(key)
    x3 = jax.random.normal(k5, (V3, N3, D3), jnp.float32)
    w3, b3 = init_params(k6, V3, D3)
    o3 = jax.block_until_ready(weight_fusion(x3, w3, b3, vmem_budget_bytes=64 * 1024))
    assert o3.shape == (N3, D3)
    assert jnp.allclose(o3, _reference(x3, w3, b3), atol=1e-5, rtol=1e-5)

    print("KERNEL_OK")
</pallas_src>

<mosaic_0001>
module attributes {stable_mosaic.version = 11 : i64} {
  func.func @fusion_kernel(%arg0: i32, %arg1: memref<4xf32, #tpu.memory_space<smem>>, %arg2: memref<4x2x128xf32, #tpu.memory_space<vmem>>, %arg3: memref<1x128xf32, #tpu.memory_space<vmem>>, %arg4: memref<2x128xf32, #tpu.memory_space<vmem>>) attributes {dimension_semantics = [#tpu.dimension_semantics<parallel>], iteration_bounds = array<i64: 1>, scalar_prefetch = 0 : i64, scratch_operands = 0 : i64, tpu.core_type = #tpu.core_type<tc>, window_params = [{transform_indices = @transform_0, window_bounds = array<i64: 4>}, {transform_indices = @transform_1, window_bounds = array<i64: 4, 2, 128>}, {pipeline_mode = #tpu.pipeline_mode<synchronous>, transform_indices = @transform_2, window_bounds = array<i64: 1, 128>}, {transform_indices = @transform_3, window_bounds = array<i64: 2, 128>}]} {
    %c0 = arith.constant 0 : index
    %c0_0 = arith.constant 0 : index
    %c0_1 = arith.constant 0 : index
    %0 = vector.load %arg2[%c0, %c0_0, %c0_1] : memref<4x2x128xf32, #tpu.memory_space<vmem>>, vector<1x2x128xf32>
    %1 = vector.shape_cast %0 : vector<1x2x128xf32> to vector<2x128xf32>
    %c0_2 = arith.constant 0 : index
    %2 = memref.load %arg1[%c0_2] : memref<4xf32, #tpu.memory_space<smem>>
    %3 = vector.broadcast %2 : f32 to vector<2x128xf32>
    %4 = arith.mulf %1, %3 : vector<2x128xf32>
    %c1 = arith.constant 1 : index
    %c0_3 = arith.constant 0 : index
    %c0_4 = arith.constant 0 : index
    %5 = vector.load %arg2[%c1, %c0_3, %c0_4] : memref<4x2x128xf32, #tpu.memory_space<vmem>>, vector<1x2x128xf32>
    %6 = vector.shape_cast %5 : vector<1x2x128xf32> to vector<2x128xf32>
    %c1_5 = arith.constant 1 : index
    %7 = memref.load %arg1[%c1_5] : memref<4xf32, #tpu.memory_space<smem>>
    %8 = vector.broadcast %7 : f32 to vector<2x128xf32>
    %9 = arith.mulf %6, %8 : vector<2x128xf32>
    %c2 = arith.constant 2 : index
    %c0_6 = arith.constant 0 : index
    %c0_7 = arith.constant 0 : index
    %10 = vector.load %arg2[%c2, %c0_6, %c0_7] : memref<4x2x128xf32, #tpu.memory_space<vmem>>, vector<1x2x128xf32>
    %11 = vector.shape_cast %10 : vector<1x2x128xf32> to vector<2x128xf32>
    %c2_8 = arith.constant 2 : index
    %12 = memref.load %arg1[%c2_8] : memref<4xf32, #tpu.memory_space<smem>>
    %13 = vector.broadcast %12 : f32 to vector<2x128xf32>
    %14 = arith.mulf %11, %13 : vector<2x128xf32>
    %c3 = arith.constant 3 : index
    %c0_9 = arith.constant 0 : index
    %c0_10 = arith.constant 0 : index
    %15 = vector.load %arg2[%c3, %c0_9, %c0_10] : memref<4x2x128xf32, #tpu.memory_space<vmem>>, vector<1x2x128xf32>
    %16 = vector.shape_cast %15 : vector<1x2x128xf32> to vector<2x128xf32>
    %c3_11 = arith.constant 3 : index
    %17 = memref.load %arg1[%c3_11] : memref<4xf32, #tpu.memory_space<smem>>
    %18 = vector.broadcast %17 : f32 to vector<2x128xf32>
    %19 = arith.mulf %16, %18 : vector<2x128xf32>
    %20 = arith.addf %4, %9 : vector<2x128xf32>
    %21 = arith.addf %14, %19 : vector<2x128xf32>
    %22 = arith.addf %20, %21 : vector<2x128xf32>
    %c0_12 = arith.constant 0 : index
    %c0_13 = arith.constant 0 : index
    %23 = vector.load %arg3[%c0_12, %c0_13] : memref<1x128xf32, #tpu.memory_space<vmem>>, vector<1x128xf32>
    %24 = vector.broadcast %23 : vector<1x128xf32> to vector<2x128xf32>
    %25 = arith.addf %22, %24 : vector<2x128xf32>
    %c0_14 = arith.constant 0 : index
    %c0_15 = arith.constant 0 : index
    %26 = vector.load %arg4[%c0_14, %c0_15] : memref<2x128xf32, #tpu.memory_space<vmem>>, vector<2x128xf32>
    tpu.vector_store %arg4[%c0_14, %c0_15], %25 {strides = array<i32>} : memref<2x128xf32, #tpu.memory_space<vmem>>, vector<2x128xf32>,
    return
  }
  func.func @transform_0(%arg0: i32) -> i32 {
    %c0_i32 = arith.constant 0 : i32
    %c0_i32_0 = arith.constant 0 : i32
    return %c0_i32 : i32
  }
  func.func @transform_1(%arg0: i32) -> (i32, i32, i32) {
    %c0_i32 = arith.constant 0 : i32
    %c0_i32_0 = arith.constant 0 : i32
    %c0_i32_1 = arith.constant 0 : i32
    return %c0_i32, %arg0, %c0_i32_0 : i32, i32, i32
  }
  func.func @transform_2(%arg0: i32) -> (i32, i32) {
    %c0_i32 = arith.constant 0 : i32
    %c0_i32_0 = arith.constant 0 : i32
    %c0_i32_1 = arith.constant 0 : i32
    return %c0_i32, %c0_i32_0 : i32, i32
  }
  func.func @transform_3(%arg0: i32) -> (i32, i32) {
    %c0_i32 = arith.constant 0 : i32
    %c0_i32_0 = arith.constant 0 : i32
    return %arg0, %c0_i32 : i32, i32
  }
}

</mosaic_0001>

<bundles_post_ra>
// kernel: tpu_custom_call.1
= control target key start
LH: loop header
LB: loop body
LE: loop exit
PB: predicated region body
PF: predicated region fallthrough
CT: control target
= control target key end

     0   :  { %8 = vsyncpa [#allocation5], 0  ;;  %s220_s0 = inlined_call_operand.hbm [shape: f32[4], index: 0, kind: input, shape index: {}]   ;;  %s221_s1 = inlined_call_operand.hbm [shape: f32[4,2,128], index: 1, kind: input, shape index: {}]   ;;  %s222_s2 = inlined_call_operand.vmem [shape: f32[1,128], index: 2, kind: input, shape index: {}]   ;;  %s223_s3 = inlined_call_operand.hbm [shape: f32[2,128], index: 3, kind: output, shape index: {}]  }
   0x1   :  { %9 = vsyncpa [#allocation3], 0 }
   0x2   :  { %10 = vsyncpa [#allocation4], 0  ;;  %s96_s14 = scalar_lea.hbm %s220_s0, 16 }
   0x3   :  { %p97_p0 = scmp.ne.s32.totalorder %s220_s0, %s96_s14  ;;  %p100_p1 = scmp.lt.u32.totalorder %s96_s14, %s220_s0 }
   0x5   :  { %p102_p2 = pnand %p100_p1, %p97_p0 }
   0x7   :  { %105 = shalt.err (!%p102_p2)
}
   0x8   :  { %s156_s19 = smov [#allocation2]   ;;  %s157_s22 = smov [#allocation6]  }
   0x9   :  { %18 = dma.hbm_to_smem %s220_s0, 16, %s156_s19, [#allocation5]  }
   0xa   :  { %s24_s23 = sshll.u32 %s157_s22, 4  ;;  %s106_s26 = scalar_lea.hbm %s221_s1, 128  ;;  %s25_s23 = int_to_ptr.vmem [resolvable:$true] %s24_s23 }
   0xb   :  { %p107_p3 = scmp.ne.s32.totalorder %s221_s1, %s106_s26  ;;  %p110_p4 = scmp.lt.u32.totalorder %s106_s26, %s221_s1 }
   0xd   :  { %p112_p5 = pnand %p110_p4, %p107_p3 }
   0xf   :  { %115 = shalt.err (!%p112_p5)
}
  0x10   :  { %s116_s4 = scalar_lea.vmem %s25_s23, 128  ;;  %p121_p7 = scmp.lt.s32.totalorder %s25_s23, %s25_s23 }
  0x11   :  { %p117_p6 = scmp.ne.s32.totalorder %s25_s23, %s116_s4  ;;  %p122_p8 = scmp.lt.s32.totalorder %s116_s4, %s116_s4 }
  0x13   :  { %p123_p9 = por %p122_p8, %p121_p7 }
  0x15   :  { %p124_p10 = pnand %p123_p9, %p117_p6 }
  0x17   :  { %127 = shalt.err (!%p124_p10)
}
  0x18   :  { %s158_s0 = smov 32   ;;  %s159_s5 = smov 2  }
  0x19   :  { %30 = dma.hbm_to_vmem [thread:$0]  %s221_s1, 128, %s25_s23, [#allocation3], %s158_s0, %s158_s0, %s159_s5  }
  0x1a   :  { %150 = dma.done.wait [#allocation5], 16  }
  0x1b   :  { %151 = vsyncadd [#allocation5], 4294967280 }
  0x1c   :  { %152 = dma.done.wait [#allocation3], 128  }
  0x1d   :  { %153 = vsyncadd [#allocation3], 4294967168 }
  0x1e   :  { %39 = sfence }
  0x1f   :  { %s41_s8 = sld [smem:[#allocation2]]  ;;  %s87_s9 = sld [smem:[#allocation2 + $0x1]]  ;;  %v40_v0 = vld [vmem:[#allocation6] sm:$0x3]  ;;  %v45_v1 = vld [vmem:[#allocation6 + $0x2] sm:$0x3] }
  0x20   :  { %s88_s10 = sld [smem:[#allocation2 + $0x2]]  ;;  %s89_s11 = sld [smem:[#allocation2 + $0x3]]  ;;  %v50_v2 = vld [vmem:[#allocation6 + $0x4] sm:$0x3]  ;;  %v55_v4 = vld [vmem:[#allocation6 + $0x6] sm:$0x3] }
  0x21   :  { %v90_v14 = vld [vmem:[%s222_s2] ss:$0 sm:$0xff]  ;;  %s160_s13 = smov [#allocation7]  }
  0x22   :  { %s77_s14 = sshll.u32 %s160_s13, 4  ;;  %s78_s14 = int_to_ptr.vmem [resolvable:$true] %s77_s14 }
  0x23   :  { %s128_s15 = scalar_lea.vmem %s78_s14, 32  ;;  %p133_p12 = scmp.lt.s32.totalorder %s78_s14, %s78_s14 }
  0x24   :  { %p129_p11 = scmp.ne.s32.totalorder %s78_s14, %s128_s15  ;;  %p134_p13 = scmp.lt.s32.totalorder %s128_s15, %s128_s15 }
  0x25   :  { %v42_v3 = vstv %s41_s8  ;;  %v47_v6 = vstv %s87_s9 }
  0x26   :  { %v43_v5 = vmul.f32 %v42_v3, %v40_v0  ;;  %v52_v7 = vstv %s88_s10  ;;  %v48_v8 = vmul.f32 %v47_v6, %v45_v1  ;;  %v57_v10 = vstv %s89_s11  ;;  %p135_p0 = por %p134_p13, %p133_p12 }
  0x27   :  { %v53_v9 = vmul.f32 %v52_v7, %v50_v2  ;;  %v58_v11 = vmul.f32 %v57_v10, %v55_v4 }
  0x28   :  { %v59_v12 = vadd.f32 %v48_v8, %v43_v5  ;;  %p136_p1 = pnand %p135_p0, %p129_p11 }
  0x29   :  { %v60_v13 = vadd.f32 %v58_v11, %v53_v9 }
  0x2b   :  { %v61_v15 = vadd.f32 %v60_v13, %v59_v12 }
  0x2d   :  { %v69_v16 = vadd.f32 %v90_v14, %v61_v15 }
  0x2f   :  { %70 = vst [vmem:[#allocation7] sm:$0x3] %v69_v16 }
  0x30   :  { %139 = shalt.err (!%p136_p1)
}
  0x31   :  { %s140_s18 = scalar_lea.hbm %s223_s3, 32 }
  0x32   :  { %p141_p2 = scmp.ne.s32.totalorder %s223_s3, %s140_s18  ;;  %p144_p3 = scmp.lt.u32.totalorder %s140_s18, %s223_s3 }
  0x34   :  { %p146_p4 = pnand %p144_p3, %p141_p2 }
  0x36   :  { %149 = shalt.err (!%p146_p4)
}
  0x37   :  { %80 = dma.vmem_to_hbm [thread:$0]  %s78_s14, 32, %s223_s3, [#allocation4]  }
  0x38   :  { %154 = dma.done.wait [#allocation4], 32  }
  0x39   :  { %155 = vsyncadd [#allocation4], 4294967264 }
  0x3a   :  { %84 = vsyncpa [#allocation3], 1 }
  0x3b   :  { %85 = vsyncpa [#allocation4], 1 }
  0x3c   :  { %86 = vsyncpa [#allocation5], 1 }

</bundles_post_ra>
